<compile_context>
chip_gen: v6e
topology: v6e:2x2x1
jax: 0.10.0
libtpu: 0.0.40
codegen_flags: <defaults>
</compile_context>

<pallas_src>
import jax
import jax.numpy as jnp
from jax import lax
from jax.experimental import pallas as pl
from jax.experimental.pallas import tpu as pltpu


_MAX_TILE_S = 4096        # hard lane-tile cap (multiple of 128)
_MIN_TILE_S = 128


def _vmem_capacity_bytes():
    """Physical VMEM of this generation; conservative v7x fallback."""
    try:
        return int(pltpu.get_tpu_info().vmem_capacity_bytes)
    except Exception:
        return 64 * 1024 * 1024


def _pick_spatial_tile(s0, n, cin, ncols, vmem_cap, in_bytes=2, out_bytes=2):
    """Largest lane tile (multiple of 128) whose double-buffered pass-2 working
    set (x tile + out tile + resident weights/shift) fits ~70% of VMEM."""
    budget = int(vmem_cap * 0.7)
    fixed = 2 * ncols * cin * in_bytes + 2 * ncols * 4 + (2 << 20)   # weights, shift, slack
    per_lane = 2 * (cin * in_bytes + ncols * out_bytes)              # double-buffered x + out
    ts = max(budget - fixed, per_lane * _MIN_TILE_S) // per_lane
    ts = max(_MIN_TILE_S, min(_MAX_TILE_S, (ts // 128) * 128))
    # v7x megacore: if N == 1 the sample axis has a single step; split the
    # spatial axis so both TensorCores get work.
    if n == 1 and s0 > 2 * _MIN_TILE_S:
        ts = min(ts, pl.cdiv(pl.cdiv(s0, 2), 128) * 128)
    if s0 <= ts:
        return s0, s0            # single full-extent tile (always legal)
    s_pad = pl.cdiv(s0, ts) * ts
    return ts, s_pad


def _stats_kernel(x_ref, g_ref, sx_ref):
    """Pass 1: per-tile Gram matrix G = x @ x^T and column sums of x (f32)."""
    x = x_ref[...]                                            # (Cin, tS) bf16
    g_ref[...] = lax.dot_general(
        x, x, (((1,), (1,)), ((), ())),
        preferred_element_type=jnp.float32)                   # (Cin, Cin)
    sx_ref[...] = jnp.sum(x.astype(jnp.float32), axis=1, keepdims=True)  # (Cin, 1)


def _conv_norm_kernel(x_ref, w_ref, shift_ref, o_ref):
    """Pass 2: (scale-folded) conv tile + shift, lane-dense bf16 store."""
    # x_ref: (Cin, tS) bf16, w_ref: (Ncols, Cin) bf16, shift: (Ncols, 1) f32
    y = jnp.dot(w_ref[...], x_ref[...], preferred_element_type=jnp.float32)
    o_ref[...] = (y + shift_ref[...]).astype(o_ref.dtype)


def transposed_conv_layer(x, weight, bias, gamma, beta, r, eps=1e-5):
    """x: (N, Cin, D, H, W); weight: (Cin, Cout, r, r, r); bias/gamma/beta: (Cout,)."""
    N, Cin, D, H, W = x.shape
    Cout = weight.shape[1]
    r3 = r * r * r
    Ncols = Cout * r3
    S0 = D * H * W

    vmem_cap = _vmem_capacity_bytes()
    ts, s_pad = _pick_spatial_tile(S0, N, Cin, Ncols, vmem_cap)
    n_tiles = s_pad // ts

    # native NCDHW layout, spatial flattened onto lanes, bf16 for the MXU
    x3 = x.reshape(N, Cin, S0).astype(jnp.bfloat16)
    if s_pad != S0:
        x3 = jnp.pad(x3, ((0, 0), (0, 0), (0, s_pad - S0)))   # zeros: no stats masking needed

    wt_bf16 = weight.reshape(Cin, Ncols).T.astype(jnp.bfloat16)   # (Ncols, Cin)
    wt_f32 = wt_bf16.astype(jnp.float32)   # exactly the values the MXU sees

    cparams = pltpu.CompilerParams(
        dimension_semantics=("parallel", "parallel"),
        vmem_limit_bytes=min(int(vmem_cap * 0.85), 112 * 1024 * 1024),
    )

    # ---- pass 1: per-(sample, tile) Gram matrix + column sums -----------------
    g_stats, sx_stats = pl.pallas_call(
        _stats_kernel,
        out_shape=(jax.ShapeDtypeStruct((N, n_tiles, Cin, Cin), jnp.float32),
                   jax.ShapeDtypeStruct((N, n_tiles, Cin, 1), jnp.float32)),
        grid_spec=pl.GridSpec(
            grid=(N, n_tiles),
            in_specs=[pl.BlockSpec((None, Cin, ts), lambda n, j: (n, 0, j))],
            out_specs=[pl.BlockSpec((None, None, Cin, Cin), lambda n, j: (n, j, 0, 0)),
                       pl.BlockSpec((None, None, Cin, 1), lambda n, j: (n, j, 0, 0))],
        ),
        compiler_params=cparams,
    )(x3)

    # ---- tiny JAX: recover GroupNorm stats, fold affine into weights/shift ----
    G = jnp.sum(g_stats, axis=1)                       # (N, Cin, Cin)
    SX = jnp.sum(sx_stats[:, :, :, 0], axis=1)         # (N, Cin)

    bias_cols = jnp.repeat(bias, r3)                   # (Ncols,)
    gamma_cols = jnp.repeat(gamma, r3)
    beta_cols = jnp.repeat(beta, r3)

    wsum = jnp.sum(wt_f32, axis=0)                     # (Cin,)
    WW = wt_f32.T @ wt_f32                             # (Cin, Cin)
    bW = bias_cols @ wt_f32                            # (Cin,)
    bsum = jnp.sum(bias_cols)
    bsq = jnp.sum(bias_cols * bias_cols)

    count = float(Ncols * S0)
    sum_n = SX @ wsum + S0 * bsum                                              # (N,)
    sumsq_n = jnp.einsum("nij,ij->n", G, WW) + 2.0 * (SX @ bW) + S0 * bsq      # (N,)
    mean = sum_n / count
    # TODO(synk): E[y^2]-E[y]^2 in f32 can lose precision when |mean| >> std;
    # a centered / Kahan accumulation would need a different stats pass.
    var = jnp.maximum(sumsq_n / count - mean * mean, 0.0)
    rstd = lax.rsqrt(var + eps)

    scale_rows = rstd[:, None] * gamma_cols[None, :]                           # (N, Ncols)
    shift_rows = beta_cols[None, :] + (bias_cols[None, :] - mean[:, None]) * scale_rows
    w_scaled = (scale_rows[:, :, None] * wt_f32[None, :, :]).astype(jnp.bfloat16)  # (N,Ncols,Cin)
    shift3 = shift_rows[:, :, None].astype(jnp.float32)                        # (N,Ncols,1)

    # ---- pass 2: recompute conv (scale folded in), add shift, write bf16 ------
    out_cols = pl.pallas_call(
        _conv_norm_kernel,
        out_shape=jax.ShapeDtypeStruct((N, Ncols, s_pad), jnp.bfloat16),
        grid_spec=pl.GridSpec(
            grid=(N, n_tiles),
            in_specs=[
                pl.BlockSpec((None, Cin, ts), lambda n, j: (n, 0, j)),
                pl.BlockSpec((None, Ncols, Cin), lambda n, j: (n, 0, 0)),
                pl.BlockSpec((None, Ncols, 1), lambda n, j: (n, 0, 0)),
            ],
            out_specs=pl.BlockSpec((None, Ncols, ts), lambda n, j: (n, 0, j)),
        ),
        compiler_params=cparams,
    )(x3, w_scaled, shift3)

    if s_pad != S0:
        out_cols = out_cols[:, :, :S0]   # padded columns hold garbage; sliced off

    # ---- scatter each r^3 block to its spatial slot (pure layout) -------------
    # TODO(synk): the final r^3 interleave stays as one XLA transpose (now bf16
    # and fused with the f32 cast under jit); an in-kernel interleaved store
    # would need lane-strided writes Mosaic does not lower reliably.
    y = out_cols.reshape(N, Cout, r, r, r, D, H, W)
    y = jnp.transpose(y, (0, 1, 5, 2, 6, 3, 7, 4))
    return y.reshape(N, Cout, D * r, H * r, W * r).astype(jnp.float32)


def _reference(x, weight, bias, gamma, beta, r):
    """Pure-JAX reference of ConvTranspose3d(k=r, stride=r) + GroupNorm(1)."""
    N, Cin, D, H, W = x.shape
    Cout = weight.shape[1]
    y = jnp.einsum("nidhw,iojkl->nodjhkwl", x, weight)
    y = y.reshape(N, Cout, D * r, H * r, W * r) + bias[None, :, None, None, None]
    mean = jnp.mean(y, axis=(1, 2, 3, 4), keepdims=True)
    var = jnp.mean(jnp.square(y - mean), axis=(1, 2, 3, 4), keepdims=True)
    yn = (y - mean) * lax.rsqrt(var + 1e-5)
    return yn * gamma[None, :, None, None, None] + beta[None, :, None, None, None]


if __name__ == "__main__":
    # small shapes consistent with the module: dim_in=8, dim_out=4, r=2
    N, Cin, Cout, r = 2, 8, 4, 2
    D = H = W = 4

    key = jax.random.PRNGKey(0)
    kx, kw, kb, kg, kbt = jax.random.split(key, 5)
    x = jax.random.normal(kx, (N, Cin, D, H, W), dtype=jnp.float32)
    weight = jax.random.normal(kw, (Cin, Cout, r, r, r), dtype=jnp.float32) * 0.1
    bias = jax.random.normal(kb, (Cout,), dtype=jnp.float32) * 0.1
    gamma = 1.0 + 0.1 * jax.random.normal(kg, (Cout,), dtype=jnp.float32)
    beta = 0.1 * jax.random.normal(kbt, (Cout,), dtype=jnp.float32)

    run = jax.jit(lambda a, w, b, g, bt: transposed_conv_layer(a, w, b, g, bt, r))
    out = jax.block_until_ready(run(x, weight, bias, gamma, beta))

    ref = _reference(x, weight, bias, gamma, beta, r)
    assert out.shape == (N, Cout, D * r, H * r, W * r)
    max_err = float(jnp.max(jnp.abs(out - ref)))
    # bf16 MXU inputs + bf16 activation store -> ~1e-2 level agreement with f32 ref
    assert jnp.allclose(out, ref, rtol=5e-2, atol=5e-2), max_err

    print("KERNEL_OK")
</pallas_src>

<mosaic_0001>
module attributes {stable_mosaic.version = 11 : i64} {
  func.func @_stats_kernel(%arg0: i32, %arg1: i32, %arg2: memref<1x8x64xbf16, #tpu.memory_space<vmem>>, %arg3: memref<1x1x8x8xf32, #tpu.memory_space<vmem>>, %arg4: memref<1x1x8x1xf32, #tpu.memory_space<vmem>>) attributes {dimension_semantics = [#tpu.dimension_semantics<parallel>, #tpu.dimension_semantics<parallel>], iteration_bounds = array<i64: 2, 1>, scalar_prefetch = 0 : i64, scratch_operands = 0 : i64, tpu.core_type = #tpu.core_type<tc>, window_params = [{transform_indices = @transform_0, window_bounds = array<i64: 1, 8, 64>}, {transform_indices = @transform_1, window_bounds = array<i64: 1, 1, 8, 8>}, {transform_indices = @transform_2, window_bounds = array<i64: 1, 1, 8, 1>}]} {
    %c0 = arith.constant 0 : index
    %c0_0 = arith.constant 0 : index
    %c0_1 = arith.constant 0 : index
    %0 = vector.load %arg2[%c0, %c0_0, %c0_1] : memref<1x8x64xbf16, #tpu.memory_space<vmem>>, vector<1x8x64xbf16>
    %1 = vector.shape_cast %0 : vector<1x8x64xbf16> to vector<8x64xbf16>
    %cst = arith.constant dense<0.000000e+00> : vector<8x8xf32>
    %2 = tpu.matmul %1, %1, %cst {dimension_numbers = #tpu.dot_dimension_numbers<[1], [1], [0], [0], [0, 0, 1, 0], [], []>} : vector<8x64xbf16>, vector<8x64xbf16>, vector<8x8xf32> -> vector<8x8xf32>
    %c0_2 = arith.constant 0 : index
    %c0_3 = arith.constant 0 : index
    %c0_4 = arith.constant 0 : index
    %c0_5 = arith.constant 0 : index
    %3 = vector.load %arg3[%c0_2, %c0_3, %c0_4, %c0_5] : memref<1x1x8x8xf32, #tpu.memory_space<vmem>>, vector<1x1x8x8xf32>
    %4 = vector.shape_cast %3 : vector<1x1x8x8xf32> to vector<8x8xf32>
    %5 = vector.shape_cast %2 : vector<8x8xf32> to vector<1x1x8x8xf32>
    tpu.vector_store %arg3[%c0_2, %c0_3, %c0_4, %c0_5], %5 {strides = array<i32>} : memref<1x1x8x8xf32, #tpu.memory_space<vmem>>, vector<1x1x8x8xf32>,
    %6 = arith.extf %1 : vector<8x64xbf16> to vector<8x64xf32>
    %cst_6 = arith.constant dense<0.000000e+00> : vector<8xf32>
    %7 = vector.multi_reduction <add>, %6, %cst_6 [1] : vector<8x64xf32> to vector<8xf32>
    %8 = vector.shape_cast %7 : vector<8xf32> to vector<8x1xf32>
    %c0_7 = arith.constant 0 : index
    %c0_8 = arith.constant 0 : index
    %c0_9 = arith.constant 0 : index
    %c0_10 = arith.constant 0 : index
    %9 = vector.load %arg4[%c0_7, %c0_8, %c0_9, %c0_10] : memref<1x1x8x1xf32, #tpu.memory_space<vmem>>, vector<1x1x8x1xf32>
    %10 = vector.shape_cast %9 : vector<1x1x8x1xf32> to vector<8x1xf32>
    %11 = vector.shape_cast %8 : vector<8x1xf32> to vector<1x1x8x1xf32>
    tpu.vector_store %arg4[%c0_7, %c0_8, %c0_9, %c0_10], %11 {strides = array<i32>} : memref<1x1x8x1xf32, #tpu.memory_space<vmem>>, vector<1x1x8x1xf32>,
    return
  }
  func.func @transform_0(%arg0: i32, %arg1: i32) -> (i32, i32, i32) {
    %c0_i32 = arith.constant 0 : i32
    %c0_i32_0 = arith.constant 0 : i32
    return %arg0, %c0_i32, %arg1 : i32, i32, i32
  }
  func.func @transform_1(%arg0: i32, %arg1: i32) -> (i32, i32, i32, i32) {
    %c0_i32 = arith.constant 0 : i32
    %c0_i32_0 = arith.constant 0 : i32
    %c0_i32_1 = arith.constant 0 : i32
    return %arg0, %arg1, %c0_i32, %c0_i32_0 : i32, i32, i32, i32
  }
  func.func @transform_2(%arg0: i32, %arg1: i32) -> (i32, i32, i32, i32) {
    %c0_i32 = arith.constant 0 : i32
    %c0_i32_0 = arith.constant 0 : i32
    %c0_i32_1 = arith.constant 0 : i32
    return %arg0, %arg1, %c0_i32, %c0_i32_0 : i32, i32, i32, i32
  }
}

module attributes {stable_mosaic.version = 11 : i64} {
  func.func @_conv_norm_kernel(%arg0: i32, %arg1: i32, %arg2: memref<1x8x64xbf16, #tpu.memory_space<vmem>>, %arg3: memref<1x32x8xbf16, #tpu.memory_space<vmem>>, %arg4: memref<1x32x1xf32, #tpu.memory_space<vmem>>, %arg5: memref<1x32x64xbf16, #tpu.memory_space<vmem>>) attributes {dimension_semantics = [#tpu.dimension_semantics<parallel>, #tpu.dimension_semantics<parallel>], iteration_bounds = array<i64: 2, 1>, scalar_prefetch = 0 : i64, scratch_operands = 0 : i64, tpu.core_type = #tpu.core_type<tc>, window_params = [{transform_indices = @transform_0, window_bounds = array<i64: 1, 8, 64>}, {transform_indices = @transform_1, window_bounds = array<i64: 1, 32, 8>}, {transform_indices = @transform_2, window_bounds = array<i64: 1, 32, 1>}, {transform_indices = @transform_3, window_bounds = array<i64: 1, 32, 64>}]} {
    %c0 = arith.constant 0 : index
    %c0_0 = arith.constant 0 : index
    %c0_1 = arith.constant 0 : index
    %0 = vector.load %arg3[%c0, %c0_0, %c0_1] : memref<1x32x8xbf16, #tpu.memory_space<vmem>>, vector<1x32x8xbf16>
    %1 = vector.shape_cast %0 : vector<1x32x8xbf16> to vector<32x8xbf16>
    %c0_2 = arith.constant 0 : index
    %c0_3 = arith.constant 0 : index
    %c0_4 = arith.constant 0 : index
    %2 = vector.load %arg2[%c0_2, %c0_3, %c0_4] : memref<1x8x64xbf16, #tpu.memory_space<vmem>>, vector<1x8x64xbf16>
    %3 = vector.shape_cast %2 : vector<1x8x64xbf16> to vector<8x64xbf16>
    %cst = arith.constant dense<0.000000e+00> : vector<32x64xf32>
    %4 = tpu.matmul %1, %3, %cst {dimension_numbers = #tpu.dot_dimension_numbers<[1], [0], [0], [1], [0, 0, 1, 1], [], []>} : vector<32x8xbf16>, vector<8x64xbf16>, vector<32x64xf32> -> vector<32x64xf32>
    %c0_5 = arith.constant 0 : index
    %c0_6 = arith.constant 0 : index
    %c0_7 = arith.constant 0 : index
    %5 = vector.load %arg4[%c0_5, %c0_6, %c0_7] : memref<1x32x1xf32, #tpu.memory_space<vmem>>, vector<1x32x1xf32>
    %6 = vector.shape_cast %5 : vector<1x32x1xf32> to vector<32x1xf32>
    %7 = vector.broadcast %6 : vector<32x1xf32> to vector<32x64xf32>
    %8 = arith.addf %4, %7 : vector<32x64xf32>
    %9 = arith.truncf %8 : vector<32x64xf32> to vector<32x64xbf16>
    %c0_8 = arith.constant 0 : index
    %c0_9 = arith.constant 0 : index
    %c0_10 = arith.constant 0 : index
    %10 = vector.load %arg5[%c0_8, %c0_9, %c0_10] : memref<1x32x64xbf16, #tpu.memory_space<vmem>>, vector<1x32x64xbf16>
    %11 = vector.shape_cast %10 : vector<1x32x64xbf16> to vector<32x64xbf16>
    %12 = vector.shape_cast %9 : vector<32x64xbf16> to vector<1x32x64xbf16>
    tpu.vector_store %arg5[%c0_8, %c0_9, %c0_10], %12 {strides = array<i32>} : memref<1x32x64xbf16, #tpu.memory_space<vmem>>, vector<1x32x64xbf16>,
    return
  }
  func.func @transform_0(%arg0: i32, %arg1: i32) -> (i32, i32, i32) {
    %c0_i32 = arith.constant 0 : i32
    %c0_i32_0 = arith.constant 0 : i32
    return %arg0, %c0_i32, %arg1 : i32, i32, i32
  }
  func.func @transform_1(%arg0: i32, %arg1: i32) -> (i32, i32, i32) {
    %c0_i32 = arith.constant 0 : i32
    %c0_i32_0 = arith.constant 0 : i32
    %c0_i32_1 = arith.constant 0 : i32
    return %arg0, %c0_i32, %c0_i32_0 : i32, i32, i32
  }
  func.func @transform_2(%arg0: i32, %arg1: i32) -> (i32, i32, i32) {
    %c0_i32 = arith.constant 0 : i32
    %c0_i32_0 = arith.constant 0 : i32
    %c0_i32_1 = arith.constant 0 : i32
    return %arg0, %c0_i32, %c0_i32_0 : i32, i32, i32
  }
  func.func @transform_3(%arg0: i32, %arg1: i32) -> (i32, i32, i32) {
    %c0_i32 = arith.constant 0 : i32
    %c0_i32_0 = arith.constant 0 : i32
    return %arg0, %c0_i32, %arg1 : i32, i32, i32
  }
}

</mosaic_0001>

<bundles_post_ra>
// kernel: mul.6
= control target key start
LH: loop header
LB: loop body
LE: loop exit
PB: predicated region body
PF: predicated region fallthrough
CT: control target
= control target key end

     0   :  { %s34_s0 = inlined_call_operand.vmem [shape: f32[4], index: 0, kind: input, shape index: {}, may-alias: {0,1}]   ;;  %s35_s1 = inlined_call_operand.vmem [shape: f32[4], index: 1, kind: input, shape index: {}, may-alias: {0,1}]   ;;  %s36_s2 = inlined_call_operand.vmem [shape: f32[4], index: 2, kind: output, shape index: {}]  }
   0x1   :  { %v3_v0 = vld [vmem:[%s34_s0] sm:$0x1] }
   0x2   :  { %v4_v1 = vld [vmem:[%s35_s1] sm:$0x1] }
   0x3   :  { %v7_v2 = vmul.f32 %v4_v1, %v3_v0 }
   0x5   :  { %9 = vst [vmem:[%s36_s2] sm:$0x1] %v7_v2 }

// kernel: _lambda_.2
= control target key start
LH: loop header
LB: loop body
LE: loop exit
PB: predicated region body
PF: predicated region fallthrough
CT: control target
= control target key end

     0   :  { %s444_s9 = smov 0   ;;  %s446_s10 = smov 0   ;;  %s480_s0 = inlined_call_operand.vmem [shape: bf16[2,8,64], index: 0, kind: input, shape index: {}]   ;;  %s481_s1 = inlined_call_operand.vmem [shape: f32[2,1,8,8], index: 1, kind: output, shape index: {0}]   ;;  %s482_s2 = inlined_call_operand.vmem [shape: f32[2,1,8,1], index: 2, kind: output, shape index: {1}]  }
   0x1   :  { %s448_s11 = smov 0  }
   0x2 LB: > { %s25_s12 = sadd.s32 1, %s421_s10  ;;  %p362_p0 = scmp.ge.s32.totalorder %s425_s11, 1  ;;  %s425_s11 = sphi %s448_s11, %s13_s11   ;;  %s421_s10 = sphi %s446_s10, %s484_s10   ;;  %s417_s9 = sphi %s444_s9, %s483_s9  }
   0x3   : > { %p27_p1 = scmp.ge.s32.totalorder %s25_s12, 2  ;;  %p135_p2 = scmp.lt.s32.totalorder %s425_s11, 3 }
   0x5   : > { %s486_s12 = smov (%p27_p1, %s25_s12), 0  ;;  %p136_p3 = pnand %p362_p0, %p135_p2 }
   0x6   : > { %p168_p4 = scmp.lt.s32.totalorder (!%p136_p3), %s417_s9, 1 }
   0x7   : > { %139 = sbr.rel (%p136_p3) target bundleno = 223 (0xdf), region = 24 }
   0xc   : > { %v427_v0 = vmov 0.0   ;;  %vm428_vm0 = vmmov 0   ;;  %s488_s9 = smov (!%p168_p4, %s417_s9), 1  ;;  %vm191_vm1 = vcmask 523264   ;;  %vm241_vm2 = vcmask 7168  }
   0xd   : > { %371 = vmatprep.subr.bf16.mxu0 %v427_v0  ;;  %373 = vmatprep.mubr.msk.bf16.mxu0 %vm428_vm0, %v427_v0  ;;  %s363_s13 = sshll.u32 %s488_s9, 2  ;;  %s364_s17 = sshll.u32 %s488_s9, 3  ;;  %vm235_vm3 = vcmask 64512  }
   0xe   : > { %s174_s16 = scalar_lea.vmem %s480_s0, %s363_s13  ;;  %s188_s20 = scalar_lea.vmem %s482_s2, %s364_s17 }
   0xf   : > { %v190_v1 = vld [vmem:[%s174_s16] sm:$0xf]  ;;  %s181_s23 = scalar_lea.vmem %s481_s1, %s364_s17 }
  0x10   : > { %v193_v2 = vsel %vm191_vm1, %v190_v1, 0  ;;  %v237_v3 = vunpack.c.l.bf16 %v190_v1 }
  0x11   : > { %372 = vmatpush3.bf16.xpose.msra.mxu0 %v193_v2 }
  0x12   : > { %v238_v4 = vsel %vm191_vm1, %v237_v3, 0.0 }
  0x13   : > { %239 = vadd.xlane.f32.xlu0 %v238_v4 }
  0x18   : > { %374 = vmatmul.mubr.msk.bf16.vlgmr.msra.gmra.mxu0 %vm191_vm1, %v190_v1 }
  0x9c   : > { %v240_v5 = vpop.xlane.xlu0 %239 }
  0x9d   : > { %242 = vst.msk [vmem:[%s188_s20] sm:$0xff] %vm241_vm2, %v240_v5 }
  0xd8   : > { %v229_v6 = vpop.f32.mrf.mxu0 }
  0xd9   : > { %236 = vst.msk [vmem:[%s181_s23] sm:$0xff] %vm235_vm3, %v229_v6 }
  0xda   : > { %v375_v7 = vpop.f32.mrf.mxu0 }
  0xdc   : > { %v232_v8 = vpop.f32.mrf.mxu0 }
  0xde   : > { %v376_v9 = vpop.f32.mrf.mxu0 }
  0xdf PF: > { %s13_s11 = sadd.s32 1, %s425_s11   ;;  %s483_s9 = smov %s421_s10 }
  0xe0   : > { %p10_p5 = scmp.ge.s32.totalorder %s13_s11, 4   ;;  %s484_s10 = smov %s486_s12 }
  0xe2   :  { %12 = sbr.rel (!%p10_p5) target bundleno = 2 (0x2), region = 66 }

// kernel: _lambda_.3
= control target key start
LH: loop header
LB: loop body
LE: loop exit
PB: predicated region body
PF: predicated region fallthrough
CT: control target
= control target key end

     0   :  { %s577_s12 = smov 0   ;;  %s579_s13 = smov 0   ;;  %s625_s0 = inlined_call_operand.vmem [shape: bf16[2,8,64], index: 0, kind: input, shape index: {}]   ;;  %s626_s1 = inlined_call_operand.vmem [shape: bf16[2,32,8], index: 1, kind: input, shape index: {}]   ;;  %s627_s2 = inlined_call_operand.vmem [shape: f32[2,32,1], index: 2, kind: input, shape index: {}]   ;;  %s628_s3 = inlined_call_operand.vmem [shape: bf16[2,32,64], index: 3, kind: output, shape index: {}]  }
   0x1   :  { %s581_s14 = smov 0  }
   0x2 LB: > { %s25_s15 = sadd.s32 1, %s550_s13  ;;  %p468_p0 = scmp.ge.s32.totalorder %s554_s14, 1  ;;  %s554_s14 = sphi %s581_s14, %s13_s14   ;;  %s550_s13 = sphi %s579_s13, %s630_s13   ;;  %s546_s12 = sphi %s577_s12, %s629_s12  }
   0x3   : > { %p27_p1 = scmp.ge.s32.totalorder %s25_s15, 2  ;;  %p175_p2 = scmp.lt.s32.totalorder %s554_s14, 3 }
   0x5   : > { %s632_s15 = smov (%p27_p1, %s25_s15), 0  ;;  %p176_p3 = pnand %p468_p0, %p175_p2 }
   0x6   : > { %p214_p4 = scmp.lt.s32.totalorder (!%p176_p3), %s546_s12, 1 }
   0x7   : > { %179 = sbr.rel (%p176_p3) target bundleno = 224 (0xe0), region = 32 }
   0xc   : > { %v556_v0 = vmov 0   ;;  %s634_s12 = smov (!%p214_p4, %s546_s12), 1  ;;  %vm286_vm0 = vcmask 1043456   ;;  %vm279_vm1 = vcmask 64512   ;;  %vm355_vm2 = vcmask 519168  }
   0xd   : > { %529 = vset.pattern.permute.xlu1 %v556_v0  ;;  %528 = vset.pattern.permute.xlu0 %v556_v0  ;;  %s469_s16 = sshll.u32 %s634_s12, 2  ;;  %s486_s17 = sshll.u32 %s634_s12, 4 }
   0xe   : > { %s220_s20 = scalar_lea.vmem %s625_s0, %s469_s16  ;;  %s225_s23 = scalar_lea.vmem %s626_s1, %s486_s17 }
   0xf   : > { %v244_v1 = vld [vmem:[%s220_s20] sm:$0xf]  ;;  %v531_v4 = vld [vmem:[%s225_s23 + $0x8] sm:$0xff]   ;;  %s487_s24 = sshll.u32 %s634_s12, 5  ;;  %s238_s30 = scalar_lea.vmem %s628_s3, %s486_s17 }
  0x10   : > { %502 = vmatprep.subr.msk.bf16.mxu0 %vm286_vm0, %v244_v1  ;;  %v288_v2 = vsel %vm286_vm0, %v244_v1, 0  ;;  %v530_v3 = vld [vmem:[%s225_s23] sm:$0xff]   ;;  %s230_s27 = scalar_lea.vmem %s627_s2, %s487_s24 }
  0x11   : > { %497 = vmatpush3.bf16.msra.mxu0 %v288_v2  ;;  %498 = vmatprep.mubr.msk.bf16.mxu0 %vm279_vm1, %v530_v3  ;;  %v247_v5 = vld [vmem:[%s230_s27 + $0x10] sm:$0xff]  ;;  %v245_v6 = vld [vmem:[%s230_s27] sm:$0xff]  ;;  %v248_v7 = vld [vmem:[%s230_s27 + $0x18] sm:$0xff] }
  0x12   : > { %261 = vperm.xlu1 %529, %v247_v5   ;;  %251 = vperm.xlu0 %528, %v245_v6   ;;  %v246_v8 = vld [vmem:[%s230_s27 + $0x8] sm:$0xff] }
  0x14   : > { %499 = vmatmul.mubr.msk.bf16.vlgmr.msra.gmra.mxu0 %vm279_vm1, %v531_v4 }
  0x16   : > { %266 = vperm.xlu1 %529, %v248_v7   ;;  %256 = vperm.xlu0 %528, %v246_v8  }
  0x8d   : > { %v262_v9 = vpop.permute.xlu1 %261  ;;  %v252_v10 = vpop.permute.xlu0 %251 }
  0x91   : > { %v267_v16 = vpop.permute.xlu1 %266  ;;  %v257_v20 = vpop.permute.xlu0 %256 }
  0xd4   : > { %v500_v11 = vpop.f32.mrf.mxu0 }
  0xd5   : > { %v333_v12 = vadd.f32 %v500_v11, %v262_v9 }
  0xd6   : > { %v324_v13 = vpop.f32.mrf.mxu0 }
  0xd7   : > { %v491_v14 = vpack.c.bf16 %v333_v12, %v333_v12  ;;  %v325_v15 = vadd.f32 %v324_v13, %v252_v10 }
  0xd8   : > { %v501_v17 = vpop.f32.mrf.mxu0 }
  0xd9   : > { %358 = vst.msk [vmem:[%s238_s30 + $0x8] sm:$0xf] %vm355_vm2, %v491_v14  ;;  %v489_v18 = vpack.c.bf16 %v325_v15, %v325_v15  ;;  %v336_v19 = vadd.f32 %v501_v17, %v267_v16 }
  0xda   : > { %v327_v21 = vpop.f32.mrf.mxu0 }
  0xdb   : > { %356 = vst.msk [vmem:[%s238_s30] sm:$0xf] %vm355_vm2, %v489_v18  ;;  %v492_v22 = vpack.c.bf16 %v336_v19, %v336_v19  ;;  %v328_v23 = vadd.f32 %v327_v21, %v257_v20 }
  0xdd   : > { %359 = vst.msk [vmem:[%s238_s30 + $0xc] sm:$0xf] %vm355_vm2, %v492_v22  ;;  %v490_v24 = vpack.c.bf16 %v328_v23, %v328_v23 }
  0xdf   : > { %357 = vst.msk [vmem:[%s238_s30 + $0x4] sm:$0xf] %vm355_vm2, %v490_v24 }
  0xe0 PF: > { %s13_s14 = sadd.s32 1, %s554_s14   ;;  %s629_s12 = smov %s550_s13 }
  0xe1   : > { %p10_p5 = scmp.ge.s32.totalorder %s13_s14, 4   ;;  %s630_s13 = smov %s632_s15 }
  0xe3   :  { %12 = sbr.rel (!%p10_p5) target bundleno = 2 (0x2), region = 68 }

</bundles_post_ra>
